<compile_context>
chip_gen: v7x
topology: tpu7x:2x2x1
jax: 0.10.0
libtpu: 0.0.40
codegen_flags: <defaults>
</compile_context>

<pallas_src>
import numpy as np
import jax
import jax.numpy as jnp
from jax.experimental import pallas as pl
from jax.experimental.pallas import tpu as pltpu


# ----------------------------------------------------------------------------
# Deterministic diffusion-schedule constants (DDPM linear beta schedule),
# standing in for the schedule the runner builds in its __init__.
# ----------------------------------------------------------------------------
NUM_DIFFUSION_T = 1000
T_STAR = 100  # args.t : noising level used by image_editing_sample


def _alpha_bar(t_star, num_t=NUM_DIFFUSION_T, beta_min=1e-4, beta_max=2e-2):
    betas = np.linspace(beta_min, beta_max, num_t, dtype=np.float64)
    ab = np.cumprod(1.0 - betas)
    return float(ab[t_star])


_AB = _alpha_bar(T_STAR)
SQRT_AB = float(np.sqrt(_AB))                    # sqrt(alpha_bar_{t*})
SQRT_ONE_MINUS_AB = float(np.sqrt(1.0 - _AB))    # sqrt(1 - alpha_bar_{t*})

# Folded affine constants:  out = A*x + B*eps + C
#   (x-0.5)*2 -> noise -> (..+1)*0.5  collapses to one FMA-style expression.
A_CONST = SQRT_AB
B_CONST = 0.5 * SQRT_ONE_MINUS_AB
C_CONST = 0.5 * (1.0 - SQRT_AB)

LANE = 512           # last-dim width: multiple of 128 -> unmasked full-width stores
MAX_BLOCK_ROWS = 1024  # 1024x512 f32 = 2 MiB per operand block


# ----------------------------------------------------------------------------
# Pallas kernel: fused purify pipeline over a dense 2D slab.
# ----------------------------------------------------------------------------
def purify_kernel(x_ref, eps_ref, o_ref):
    x = x_ref[...]
    eps = eps_ref[...]
    # TODO(synk): the reverse-SDE denoising loop runs the external guided-diffusion
    # score U-Net (self.runner); its weights/architecture are not defined in this
    # module, so the reverse pass is identity and only the forward-noising +
    # rescalings are computed here (folded into one affine map).
    o_ref[...] = (A_CONST * x + B_CONST * eps + C_CONST).astype(o_ref.dtype)


def _round_up(v, m):
    return ((v + m - 1) // m) * m


def sde_adv_purify(x_nchw, key):
    """x_nchw: float32 [N, C, H, W] in [0, 1]. Returns same shape/dtype."""
    orig_shape = x_nchw.shape
    orig_dtype = x_nchw.dtype
    total = int(np.prod(orig_shape))

    # Noise for the forward-diffusion step (torch.randn_like equivalent).
    eps = jax.random.normal(key, orig_shape, dtype=jnp.float32)

    # Flatten to a lane-dense (rows, LANE) slab; pad tail with zeros.
    rows = pl.cdiv(total, LANE)
    block_rows = min(MAX_BLOCK_ROWS, _round_up(rows, 8))
    rows_padded = _round_up(rows, block_rows)
    padded_total = rows_padded * LANE

    xf = x_nchw.astype(jnp.float32).reshape(-1)
    ef = eps.reshape(-1)
    pad = padded_total - total
    if pad:
        xf = jnp.pad(xf, (0, pad))
        ef = jnp.pad(ef, (0, pad))
    x2 = xf.reshape(rows_padded, LANE)
    e2 = ef.reshape(rows_padded, LANE)

    grid = (rows_padded // block_rows,)

    out = pl.pallas_call(
        purify_kernel,
        out_shape=jax.ShapeDtypeStruct((rows_padded, LANE), jnp.float32),
        grid=grid,
        in_specs=[
            pl.BlockSpec((block_rows, LANE), lambda i: (i, 0)),
            pl.BlockSpec((block_rows, LANE), lambda i: (i, 0)),
        ],
        out_specs=pl.BlockSpec((block_rows, LANE), lambda i: (i, 0)),
        compiler_params=pltpu.CompilerParams(
            # Blocks are fully independent -> shard across TCs on v7x.
            dimension_semantics=("parallel",),
        ),
        cost_estimate=pl.CostEstimate(
            flops=4 * padded_total,
            transcendentals=0,
            bytes_accessed=12 * padded_total,  # 2 f32 reads + 1 f32 write / elem
        ),
    )(x2, e2)

    return out.reshape(-1)[:total].reshape(orig_shape).astype(orig_dtype)


# ----------------------------------------------------------------------------
# Thin Python wrapper mirroring SDE_Adv_Model (counter buffer, purify mode).
# ----------------------------------------------------------------------------
class SDEAdvModel:
    def __init__(self, domain="celebahq", seed=0):
        self.domain = domain            # 'imagenet' would add bilinear resizes
        self.counter = 0                # mirrors register_buffer('counter', ...)
        self.tag = None
        self.base_key = jax.random.PRNGKey(seed)

    def set_tag(self, tag=None):
        self.tag = tag

    def reset_counter(self):
        self.counter = 0

    def __call__(self, x, mode="purify"):
        if mode != "purify":
            raise NotImplementedError(f"unknown mode: {mode}")
        if "imagenet" in self.domain:
            # TODO(synk): F.interpolate bilinear 256->...->224 resize branch not
            # implemented in-kernel; face domains (celebahq) never take it.
            raise NotImplementedError("imagenet resize branch not implemented")
        # fold_in(counter) gives non-overlapping noise streams across calls
        # (no seed reuse between batch k image i and batch k+1 image i-1).
        key = jax.random.fold_in(self.base_key, self.counter)
        out = sde_adv_purify(x, key)
        self.counter += 1               # self.counter += 1
        return out


if __name__ == "__main__":
    key = jax.random.PRNGKey(0)
    N, C, H, W = 2, 3, 16, 16
    x = jax.random.uniform(key, (N, C, H, W), dtype=jnp.float32)  # images in [0,1]

    model = SDEAdvModel(domain="celebahq", seed=0)
    out = model(x, mode="purify")
    out = jax.block_until_ready(out)

    assert out.shape == (N, C, H, W), out.shape
    assert out.dtype == jnp.float32, out.dtype
    assert bool(jnp.all(jnp.isfinite(out))), "non-finite output"

    # Reference check of the fused affine map (reverse-SDE pass is identity).
    eps_ref = jax.random.normal(jax.random.fold_in(jax.random.PRNGKey(0), 0),
                                (N, C, H, W), dtype=jnp.float32)
    x_in = (x - 0.5) * 2.0
    x_t = SQRT_AB * x_in + SQRT_ONE_MINUS_AB * eps_ref
    ref = (x_t + 1.0) * 0.5
    assert bool(jnp.allclose(out, ref, atol=1e-5, rtol=1e-5)), "mismatch vs reference"

    print("KERNEL_OK")
</pallas_src>

<mosaic_0001>
module attributes {stable_mosaic.version = 11 : i64} {
  func.func @purify_kernel(%arg0: i32, %arg1: memref<8x512xf32, #tpu.memory_space<vmem>>, %arg2: memref<8x512xf32, #tpu.memory_space<vmem>>, %arg3: memref<8x512xf32, #tpu.memory_space<vmem>>) attributes {dimension_semantics = [#tpu.dimension_semantics<parallel>], iteration_bounds = array<i64: 1>, scalar_prefetch = 0 : i64, scratch_operands = 0 : i64, tpu.core_type = #tpu.core_type<tc>, window_params = [{transform_indices = @transform_0, window_bounds = array<i64: 8, 512>}, {transform_indices = @transform_1, window_bounds = array<i64: 8, 512>}, {transform_indices = @transform_2, window_bounds = array<i64: 8, 512>}]} {
    %c0 = arith.constant 0 : index
    %c0_0 = arith.constant 0 : index
    %0 = vector.load %arg1[%c0, %c0_0] : memref<8x512xf32, #tpu.memory_space<vmem>>, vector<8x512xf32>
    %c0_1 = arith.constant 0 : index
    %c0_2 = arith.constant 0 : index
    %1 = vector.load %arg2[%c0_1, %c0_2] : memref<8x512xf32, #tpu.memory_space<vmem>>, vector<8x512xf32>
    %cst = arith.constant 0.946119248 : f32
    %2 = vector.broadcast %cst : f32 to vector<8x512xf32>
    %3 = arith.mulf %2, %0 : vector<8x512xf32>
    %cst_3 = arith.constant 0.161909238 : f32
    %4 = vector.broadcast %cst_3 : f32 to vector<8x512xf32>
    %5 = arith.mulf %4, %1 : vector<8x512xf32>
    %6 = arith.addf %3, %5 : vector<8x512xf32>
    %cst_4 = arith.constant 0.0269403867 : f32
    %7 = vector.broadcast %cst_4 : f32 to vector<8x512xf32>
    %8 = arith.addf %6, %7 : vector<8x512xf32>
    %c0_5 = arith.constant 0 : index
    %c0_6 = arith.constant 0 : index
    %9 = vector.load %arg3[%c0_5, %c0_6] : memref<8x512xf32, #tpu.memory_space<vmem>>, vector<8x512xf32>
    tpu.vector_store %arg3[%c0_5, %c0_6], %8 {strides = array<i32>} : memref<8x512xf32, #tpu.memory_space<vmem>>, vector<8x512xf32>,
    return
  }
  func.func @transform_0(%arg0: i32) -> (i32, i32) {
    %c0_i32 = arith.constant 0 : i32
    %c0_i32_0 = arith.constant 0 : i32
    return %arg0, %c0_i32 : i32, i32
  }
  func.func @transform_1(%arg0: i32) -> (i32, i32) {
    %c0_i32 = arith.constant 0 : i32
    %c0_i32_0 = arith.constant 0 : i32
    return %arg0, %c0_i32 : i32, i32
  }
  func.func @transform_2(%arg0: i32) -> (i32, i32) {
    %c0_i32 = arith.constant 0 : i32
    %c0_i32_0 = arith.constant 0 : i32
    return %arg0, %c0_i32 : i32, i32
  }
}

</mosaic_0001>

<bundles_post_ra>
// kernel: tpu_custom_call.1
= control target key start
LH: loop header
LB: loop body
LE: loop exit
PB: predicated region body
PF: predicated region fallthrough
CT: control target
= control target key end

     0   :  { %7 = vsyncpa [#allocation3], 0  ;;  %s209_s0 = inlined_call_operand.hbm [shape: f32[8,512], index: 0, kind: input, shape index: {}]   ;;  %s210_s1 = inlined_call_operand.hbm [shape: f32[8,512], index: 1, kind: input, shape index: {}]   ;;  %s211_s2 = inlined_call_operand.hbm [shape: f32[8,512], index: 2, kind: output, shape index: {}]  }
   0x1   :  { %8 = vsyncpa [#allocation6], 0 }
   0x2   :  { %9 = vsyncpa [#allocation4], 0  ;;  %s155_s9 = smov [#allocation2]   ;;  %s156_s11 = smov [#allocation5]  }
   0x3   :  { %s16_s10 = sshll.u32 %s155_s9, 4  ;;  %s26_s12 = sshll.u32 %s156_s11, 4  ;;  %s17_s10 = int_to_ptr.vmem [resolvable:$true] %s16_s10  ;;  %s27_s12 = int_to_ptr.vmem [resolvable:$true] %s26_s12 }
   0x4   :  { %s83_s15 = scalar_lea.hbm %s209_s0, 512 }
   0x5   :  { %p84_p0 = scmp.ne.s32.totalorder %s209_s0, %s83_s15  ;;  %p87_p1 = scmp.lt.u32.totalorder %s83_s15, %s209_s0 }
   0x7   :  { %p89_p2 = pnand %p87_p1, %p84_p0 }
   0x9   :  { %92 = shalt.err (!%p89_p2)
}
   0xa   :  { %s93_s20 = scalar_lea.vmem %s17_s10, 512  ;;  %p98_p4 = scmp.lt.s32.totalorder %s17_s10, %s17_s10 }
   0xb   :  { %p94_p3 = scmp.ne.s32.totalorder %s17_s10, %s93_s20  ;;  %p99_p5 = scmp.lt.s32.totalorder %s93_s20, %s93_s20 }
   0xd   :  { %p100_p6 = por %p99_p5, %p98_p4 }
   0xf   :  { %p101_p7 = pnand %p100_p6, %p94_p3 }
  0x11   :  { %104 = shalt.err (!%p101_p7)
}
  0x12   :  { %19 = dma.hbm_to_vmem [thread:$0]  %s209_s0, 512, %s17_s10, [#allocation3]  }
  0x13   :  { %s105_s25 = scalar_lea.hbm %s210_s1, 512 }
  0x14   :  { %p106_p8 = scmp.ne.s32.totalorder %s210_s1, %s105_s25  ;;  %p109_p9 = scmp.lt.u32.totalorder %s105_s25, %s210_s1 }
  0x16   :  { %p111_p10 = pnand %p109_p9, %p106_p8 }
  0x18   :  { %114 = shalt.err (!%p111_p10)
}
  0x19   :  { %s115_s30 = scalar_lea.vmem %s27_s12, 512  ;;  %p120_p12 = scmp.lt.s32.totalorder %s27_s12, %s27_s12 }
  0x1a   :  { %p116_p11 = scmp.ne.s32.totalorder %s27_s12, %s115_s30  ;;  %p121_p13 = scmp.lt.s32.totalorder %s115_s30, %s115_s30 }
  0x1c   :  { %p122_p0 = por %p121_p13, %p120_p12 }
  0x1e   :  { %p123_p1 = pnand %p122_p0, %p116_p11 }
  0x20   :  { %126 = shalt.err (!%p123_p1)
}
  0x21   :  { %29 = dma.hbm_to_vmem [thread:$0]  %s210_s1, 512, %s27_s12, [#allocation6]  }
  0x22   :  { %149 = dma.done.wait [#allocation3], 512  }
  0x23   :  { %150 = vsyncadd [#allocation3], 4294966784 }
  0x24   :  { %151 = dma.done.wait [#allocation6], 512  }
  0x25   :  { %152 = vsyncadd [#allocation6], 4294966784  ;;  %v36_v0 = vld [vmem:[#allocation2] sm:$0xff]  ;;  %v37_v2 = vld [vmem:[#allocation2 + $0x8] sm:$0xff]  ;;  %s157_s1 = smov [#allocation7]  }
  0x26   :  { %v40_v1 = vld [vmem:[#allocation5] sm:$0xff]  ;;  %v44_v3 = vmul.f32 0.94611925, %v36_v0  ;;  %v41_v5 = vld [vmem:[#allocation5 + $0x8] sm:$0xff]  ;;  %v38_v6 = vld [vmem:[#allocation2 + $0x10] sm:$0xff]  ;;  %s70_s4 = sshll.u32 %s157_s1, 4  ;;  %s71_s4 = int_to_ptr.vmem [resolvable:$true] %s70_s4 }
  0x27   :  { %v48_v4 = vmul.f32 0.16190924, %v40_v1  ;;  %v45_v7 = vmul.f32 0.94611925, %v37_v2  ;;  %v49_v8 = vmul.f32 0.16190924, %v41_v5  ;;  %p132_p3 = scmp.lt.s32.totalorder %s71_s4, %s71_s4 }
  0x28   :  { %v42_v9 = vld [vmem:[#allocation5 + $0x10] sm:$0xff]  ;;  %v39_v10 = vld [vmem:[#allocation2 + $0x18] sm:$0xff]  ;;  %v46_v12 = vmul.f32 0.94611925, %v38_v6  ;;  %s127_s5 = scalar_lea.vmem %s71_s4, 512 }
  0x29   :  { %v52_v11 = vadd.f32 %v48_v4, %v44_v3  ;;  %v50_v13 = vmul.f32 0.16190924, %v42_v9  ;;  %v43_v14 = vld [vmem:[#allocation5 + $0x18] sm:$0xff]  ;;  %v53_v15 = vadd.f32 %v49_v8, %v45_v7  ;;  %v47_v16 = vmul.f32 0.94611925, %v39_v10  ;;  %p128_p2 = scmp.ne.s32.totalorder %s71_s4, %s127_s5  ;;  %p133_p4 = scmp.lt.s32.totalorder %s127_s5, %s127_s5 }
  0x2a   :  { %v51_v17 = vmul.f32 0.16190924, %v43_v14 }
  0x2b   :  { %v56_v18 = vadd.f32 0.026940387, %v52_v11  ;;  %v54_v19 = vadd.f32 %v50_v13, %v46_v12  ;;  %v57_v20 = vadd.f32 0.026940387, %v53_v15  ;;  %p134_p5 = por %p133_p4, %p132_p3 }
  0x2c   :  { %v55_v21 = vadd.f32 %v51_v17, %v47_v16 }
  0x2d   :  { %60 = vst [vmem:[#allocation7] sm:$0xff] %v56_v18  ;;  %v58_v22 = vadd.f32 0.026940387, %v54_v19  ;;  %61 = vst [vmem:[#allocation7 + $0x8] sm:$0xff] %v57_v20  ;;  %p135_p6 = pnand %p134_p5, %p128_p2 }
  0x2e   :  { %v59_v23 = vadd.f32 0.026940387, %v55_v21 }
  0x2f   :  { %62 = vst [vmem:[#allocation7 + $0x10] sm:$0xff] %v58_v22 }
  0x30   :  { %63 = vst [vmem:[#allocation7 + $0x18] sm:$0xff] %v59_v23 }
  0x31   :  { %138 = shalt.err (!%p135_p6)
}
  0x32   :  { %s139_s8 = scalar_lea.hbm %s211_s2, 512 }
  0x33   :  { %p140_p7 = scmp.ne.s32.totalorder %s211_s2, %s139_s8  ;;  %p143_p8 = scmp.lt.u32.totalorder %s139_s8, %s211_s2 }
  0x35   :  { %p145_p9 = pnand %p143_p8, %p140_p7 }
  0x37   :  { %148 = shalt.err (!%p145_p9)
}
  0x38   :  { %73 = dma.vmem_to_hbm [thread:$0]  %s71_s4, 512, %s211_s2, [#allocation4]  }
  0x39   :  { %153 = dma.done.wait [#allocation4], 512  }
  0x3a   :  { %154 = vsyncadd [#allocation4], 4294966784 }
  0x3b   :  { %77 = vsyncpa [#allocation3], 1 }
  0x3c   :  { %78 = vsyncpa [#allocation6], 1 }
  0x3d   :  { %79 = vsyncpa [#allocation4], 1 }

</bundles_post_ra>
